<compile_context>
chip_gen: v7x
topology: tpu7x:2x2x1
jax: 0.10.0
libtpu: 0.0.40
codegen_flags: <defaults>
</compile_context>

<pallas_src>
import math

import jax
import jax.numpy as jnp
from jax.experimental import pallas as pl
from jax.experimental.pallas import tpu as pltpu

NEG_SLOPE = 0.1


def _leaky_relu(v, slope=NEG_SLOPE):
    return jnp.where(v > 0, v, slope * v)


def resblock_kernel(x_ref, w1_ref, b1_ref, w2_ref, b2_ref, o_ref):
    # x tile: (TB, P) f32; weights: (P, P) bf16, VMEM-resident; biases: (1, P) f32.
    x = x_ref[...]

    # l1 + LeakyReLU(0.1)   (bf16 MXU inputs, f32 accumulation)
    y = jnp.dot(x.astype(jnp.bfloat16), w1_ref[...],
                preferred_element_type=jnp.float32) + b1_ref[...]
    y = _leaky_relu(y)

    # l2 (no activation before the residual)
    y = jnp.dot(y.astype(jnp.bfloat16), w2_ref[...],
                preferred_element_type=jnp.float32) + b2_ref[...]

    # residual add + LeakyReLU(0.1), all in f32
    o_ref[...] = _leaky_relu(x + y)


def _choose_pack(hidden_dim):
    """Packing factor so pack*hidden_dim is a full lane width (128 on v5e,
    256 on v6e/v7x whose MXU is 2x256x256)."""
    if hidden_dim % 128 == 0:
        return 1
    pack = 128 // math.gcd(hidden_dim, 128)
    try:
        kind = jax.devices()[0].device_kind.lower()
    except Exception:  # pragma: no cover - CPU interpret fallback etc.
        kind = ""
    target = 256 if ("v6" in kind or "v7" in kind) else 128
    while pack * hidden_dim < target and pack * hidden_dim * 2 <= 512:
        pack *= 2
    if pack * hidden_dim > 1024:  # pathological hidden_dim: don't blow up weights
        pack = 1
    return pack


def resblock_forward(x, w1, b1, w2, b2, *, pack=None, block_rows=2048):
    """ResBlock forward.

    x  : (..., H) float32
    w1, w2 : (H, H) float32 weights in (in, out) layout (torch weight, transposed)
    b1, b2 : (H,) or (1, H) float32 biases
    """
    orig_shape = x.shape
    H = orig_shape[-1]
    x2 = x.reshape(-1, H)
    B = x2.shape[0]

    if pack is None:
        pack = _choose_pack(H)
    P = pack * H

    b1 = jnp.reshape(b1, (1, H))
    b2 = jnp.reshape(b2, (1, H))

    # --- Lane packing: (B, H) -> (rows, pack*H) with block-diagonal weights ---
    pad = (-B) % pack
    x_p = jnp.pad(x2, ((0, pad), (0, 0))) if pad else x2
    rows = (B + pad) // pack
    x_p = x_p.reshape(rows, P)

    eye = jnp.eye(pack, dtype=jnp.float32)
    w1_p = jnp.kron(eye, w1).astype(jnp.bfloat16)   # (P, P) block-diagonal
    w2_p = jnp.kron(eye, w2).astype(jnp.bfloat16)
    b1_p = jnp.tile(b1, (1, pack))                   # (1, P)
    b2_p = jnp.tile(b2, (1, pack))

    # --- Tiling over (packed) batch rows ---
    tb = rows if rows <= block_rows else block_rows  # tb is 2048 (mult of 8) or full extent
    grid = (pl.cdiv(rows, tb),)

    x_spec = pl.BlockSpec((tb, P), lambda i: (i, 0))          # streamed over batch
    w_spec = pl.BlockSpec((P, P), lambda i: (0, 0),
                          pipeline_mode=pl.Buffered(1))       # VMEM-resident, single-buffered
    b_spec = pl.BlockSpec((1, P), lambda i: (0, 0),
                          pipeline_mode=pl.Buffered(1))

    # VMEM budget at defaults: 2*(x + out) double-buffered tiles (~4-8 MiB)
    # + weights (<=256 KiB) -- comfortably under 32 MiB on v5e/v6e/v7x.
    out_p = pl.pallas_call(
        resblock_kernel,
        out_shape=jax.ShapeDtypeStruct((rows, P), jnp.float32),
        grid=grid,
        in_specs=[x_spec, w_spec, b_spec, w_spec, b_spec],
        out_specs=x_spec,
        compiler_params=pltpu.CompilerParams(
            dimension_semantics=("parallel",),
            vmem_limit_bytes=32 * 1024 * 1024,
        ),
    )(x_p, w1_p, b1_p, w2_p, b2_p)

    out = out_p.reshape(rows * pack, H)
    if pad:
        out = out[:B]
    return out.reshape(orig_shape)


def init_params(key, hidden_dim):
    """PyTorch-like init; weights returned in (in, out) layout, biases (1, out)."""
    params = []
    for i in range(2):
        kw, kb = jax.random.split(jax.random.fold_in(key, i))
        scale = 1.0 / jnp.sqrt(jnp.float32(hidden_dim))
        w = jax.random.uniform(kw, (hidden_dim, hidden_dim), jnp.float32, -scale, scale)
        b = jax.random.uniform(kb, (1, hidden_dim), jnp.float32, -scale, scale)
        params.append((w, b))
    return params


def resblock_ref(x, w1, b1, w2, b2):
    """Pure-JAX f32 reference (matches the PyTorch forward)."""
    y = _leaky_relu(x @ w1 + b1)
    y = y @ w2 + b2
    return _leaky_relu(x + y)


if __name__ == "__main__":
    hidden_dim = 32
    batch = 64

    key = jax.random.PRNGKey(0)
    kx, kp = jax.random.split(key)
    x = jax.random.normal(kx, (batch, hidden_dim), jnp.float32)
    (w1, b1), (w2, b2) = init_params(kp, hidden_dim)

    ref = resblock_ref(x, w1, b1, w2, b2)

    # 1) Default config: auto pack per device generation, large batch tile.
    out = resblock_forward(x, w1, b1, w2, b2)
    out = jax.block_until_ready(out)
    assert out.shape == (batch, hidden_dim)
    # Tolerance loosened vs pure-f32 because matmul inputs are bf16.
    assert jnp.allclose(out, ref, atol=2e-2, rtol=2e-2)

    # 2) Small-tile config: exercises the multi-step pipelined batch grid
    #    (grid=(2,)) and the ragged/padding-free packed path.
    out2 = resblock_forward(x, w1, b1, w2, b2, pack=4, block_rows=8)
    out2 = jax.block_until_ready(out2)
    assert jnp.allclose(out2, ref, atol=2e-2, rtol=2e-2)

    print("KERNEL_OK")
</pallas_src>

<mosaic_0001>
module attributes {stable_mosaic.version = 11 : i64} {
  func.func @resblock_kernel(%arg0: i32, %arg1: memref<16x128xf32, #tpu.memory_space<vmem>>, %arg2: memref<128x128xbf16, #tpu.memory_space<vmem>>, %arg3: memref<1x128xf32, #tpu.memory_space<vmem>>, %arg4: memref<128x128xbf16, #tpu.memory_space<vmem>>, %arg5: memref<1x128xf32, #tpu.memory_space<vmem>>, %arg6: memref<16x128xf32, #tpu.memory_space<vmem>>) attributes {dimension_semantics = [#tpu.dimension_semantics<parallel>], iteration_bounds = array<i64: 1>, scalar_prefetch = 0 : i64, scratch_operands = 0 : i64, tpu.core_type = #tpu.core_type<tc>, window_params = [{transform_indices = @transform_0, window_bounds = array<i64: 16, 128>}, {pipeline_mode = #tpu.pipeline_mode<synchronous>, transform_indices = @transform_1, window_bounds = array<i64: 128, 128>}, {pipeline_mode = #tpu.pipeline_mode<synchronous>, transform_indices = @transform_2, window_bounds = array<i64: 1, 128>}, {pipeline_mode = #tpu.pipeline_mode<synchronous>, transform_indices = @transform_3, window_bounds = array<i64: 128, 128>}, {pipeline_mode = #tpu.pipeline_mode<synchronous>, transform_indices = @transform_4, window_bounds = array<i64: 1, 128>}, {transform_indices = @transform_5, window_bounds = array<i64: 16, 128>}]} {
    %c0 = arith.constant 0 : index
    %c0_0 = arith.constant 0 : index
    %0 = vector.load %arg1[%c0, %c0_0] : memref<16x128xf32, #tpu.memory_space<vmem>>, vector<16x128xf32>
    %1 = arith.truncf %0 : vector<16x128xf32> to vector<16x128xbf16>
    %c0_1 = arith.constant 0 : index
    %c0_2 = arith.constant 0 : index
    %2 = vector.load %arg2[%c0_1, %c0_2] : memref<128x128xbf16, #tpu.memory_space<vmem>>, vector<128x128xbf16>
    %cst = arith.constant dense<0.000000e+00> : vector<16x128xf32>
    %3 = tpu.matmul %1, %2, %cst {dimension_numbers = #tpu.dot_dimension_numbers<[1], [0], [0], [1], [0, 0, 1, 1], [], []>} : vector<16x128xbf16>, vector<128x128xbf16>, vector<16x128xf32> -> vector<16x128xf32>
    %c0_3 = arith.constant 0 : index
    %c0_4 = arith.constant 0 : index
    %4 = vector.load %arg3[%c0_3, %c0_4] : memref<1x128xf32, #tpu.memory_space<vmem>>, vector<1x128xf32>
    %5 = vector.broadcast %4 : vector<1x128xf32> to vector<16x128xf32>
    %6 = arith.addf %3, %5 : vector<16x128xf32>
    %cst_5 = arith.constant 0.000000e+00 : f32
    %7 = vector.broadcast %cst_5 : f32 to vector<16x128xf32>
    %8 = arith.cmpf ogt, %6, %7 : vector<16x128xf32>
    %cst_6 = arith.constant 1.000000e-01 : f32
    %9 = vector.broadcast %cst_6 : f32 to vector<16x128xf32>
    %10 = arith.mulf %9, %6 : vector<16x128xf32>
    %11 = arith.select %8, %6, %10 : vector<16x128xi1>, vector<16x128xf32>
    %12 = arith.truncf %11 : vector<16x128xf32> to vector<16x128xbf16>
    %c0_7 = arith.constant 0 : index
    %c0_8 = arith.constant 0 : index
    %13 = vector.load %arg4[%c0_7, %c0_8] : memref<128x128xbf16, #tpu.memory_space<vmem>>, vector<128x128xbf16>
    %cst_9 = arith.constant dense<0.000000e+00> : vector<16x128xf32>
    %14 = tpu.matmul %12, %13, %cst_9 {dimension_numbers = #tpu.dot_dimension_numbers<[1], [0], [0], [1], [0, 0, 1, 1], [], []>} : vector<16x128xbf16>, vector<128x128xbf16>, vector<16x128xf32> -> vector<16x128xf32>
    %c0_10 = arith.constant 0 : index
    %c0_11 = arith.constant 0 : index
    %15 = vector.load %arg5[%c0_10, %c0_11] : memref<1x128xf32, #tpu.memory_space<vmem>>, vector<1x128xf32>
    %16 = vector.broadcast %15 : vector<1x128xf32> to vector<16x128xf32>
    %17 = arith.addf %14, %16 : vector<16x128xf32>
    %18 = arith.addf %0, %17 : vector<16x128xf32>
    %cst_12 = arith.constant 0.000000e+00 : f32
    %19 = vector.broadcast %cst_12 : f32 to vector<16x128xf32>
    %20 = arith.cmpf ogt, %18, %19 : vector<16x128xf32>
    %cst_13 = arith.constant 1.000000e-01 : f32
    %21 = vector.broadcast %cst_13 : f32 to vector<16x128xf32>
    %22 = arith.mulf %21, %18 : vector<16x128xf32>
    %23 = arith.select %20, %18, %22 : vector<16x128xi1>, vector<16x128xf32>
    %c0_14 = arith.constant 0 : index
    %c0_15 = arith.constant 0 : index
    %24 = vector.load %arg6[%c0_14, %c0_15] : memref<16x128xf32, #tpu.memory_space<vmem>>, vector<16x128xf32>
    tpu.vector_store %arg6[%c0_14, %c0_15], %23 {strides = array<i32>} : memref<16x128xf32, #tpu.memory_space<vmem>>, vector<16x128xf32>,
    return
  }
  func.func @transform_0(%arg0: i32) -> (i32, i32) {
    %c0_i32 = arith.constant 0 : i32
    %c0_i32_0 = arith.constant 0 : i32
    return %arg0, %c0_i32 : i32, i32
  }
  func.func @transform_1(%arg0: i32) -> (i32, i32) {
    %c0_i32 = arith.constant 0 : i32
    %c0_i32_0 = arith.constant 0 : i32
    %c0_i32_1 = arith.constant 0 : i32
    return %c0_i32, %c0_i32_0 : i32, i32
  }
  func.func @transform_2(%arg0: i32) -> (i32, i32) {
    %c0_i32 = arith.constant 0 : i32
    %c0_i32_0 = arith.constant 0 : i32
    %c0_i32_1 = arith.constant 0 : i32
    return %c0_i32, %c0_i32_0 : i32, i32
  }
  func.func @transform_3(%arg0: i32) -> (i32, i32) {
    %c0_i32 = arith.constant 0 : i32
    %c0_i32_0 = arith.constant 0 : i32
    %c0_i32_1 = arith.constant 0 : i32
    return %c0_i32, %c0_i32_0 : i32, i32
  }
  func.func @transform_4(%arg0: i32) -> (i32, i32) {
    %c0_i32 = arith.constant 0 : i32
    %c0_i32_0 = arith.constant 0 : i32
    %c0_i32_1 = arith.constant 0 : i32
    return %c0_i32, %c0_i32_0 : i32, i32
  }
  func.func @transform_5(%arg0: i32) -> (i32, i32) {
    %c0_i32 = arith.constant 0 : i32
    %c0_i32_0 = arith.constant 0 : i32
    return %arg0, %c0_i32 : i32, i32
  }
}

</mosaic_0001>

<bundles_post_ra>
// kernel: tpu_custom_call.1
= control target key start
LH: loop header
LB: loop body
LE: loop exit
PB: predicated region body
PF: predicated region fallthrough
CT: control target
= control target key end

     0   :  { %10 = vsyncpa [#allocation3], 0  ;;  %s627_s0 = inlined_call_operand.hbm [shape: f32[16,128], index: 0, kind: input, shape index: {}]   ;;  %s628_s1 = inlined_call_operand.hbm [shape: bf16[128,128], index: 1, kind: input, shape index: {}]   ;;  %s629_s2 = inlined_call_operand.vmem [shape: f32[1,128], index: 2, kind: input, shape index: {}]   ;;  %s630_s3 = inlined_call_operand.hbm [shape: bf16[128,128], index: 3, kind: input, shape index: {}]   ;;  %s631_s4 = inlined_call_operand.vmem [shape: f32[1,128], index: 4, kind: input, shape index: {}]   ;;  %s632_s5 = inlined_call_operand.hbm [shape: f32[16,128], index: 5, kind: output, shape index: {}]  }
   0x1   :  { %11 = vsyncpa [#allocation6], 0 }
   0x2   :  { %12 = vsyncpa [#allocation4], 0  ;;  %s521_s18 = smov [#allocation5]   ;;  %s427_s22 = scalar_lea.hbm %s628_s1, 1024 }
   0x3   :  { %s30_s19 = sshll.u32 %s521_s18, 4  ;;  %p428_p0 = scmp.ne.s32.totalorder %s628_s1, %s427_s22  ;;  %s31_s19 = int_to_ptr.vmem [resolvable:$true] %s30_s19 }
   0x4   :  { %p431_p1 = scmp.lt.u32.totalorder %s427_s22, %s628_s1 }
   0x6   :  { %p433_p2 = pnand %p431_p1, %p428_p0 }
   0x8   :  { %436 = shalt.err (!%p433_p2)
}
   0x9   :  { %s437_s27 = scalar_lea.vmem %s31_s19, 1024  ;;  %p442_p4 = scmp.lt.s32.totalorder %s31_s19, %s31_s19 }
   0xa   :  { %p438_p3 = scmp.ne.s32.totalorder %s31_s19, %s437_s27  ;;  %p443_p5 = scmp.lt.s32.totalorder %s437_s27, %s437_s27 }
   0xc   :  { %p444_p6 = por %p443_p5, %p442_p4 }
   0xe   :  { %p445_p7 = pnand %p444_p6, %p438_p3 }
  0x10   :  { %448 = shalt.err (!%p445_p7)
}
  0x11   :  { %s522_s28 = smov 64   ;;  %s523_s29 = smov 4  }
  0x12   :  { %36 = dma.hbm_to_vmem [thread:$0]  %s628_s1, 1024, %s31_s19, [#allocation6], %s522_s28, %s522_s28, %s523_s29  }
  0x13   :  { %s524_s7 = smov [#allocation2]   ;;  %s449_s11 = scalar_lea.hbm %s627_s0, 256 }
  0x14   :  { %s18_s8 = sshll.u32 %s524_s7, 4  ;;  %p450_p8 = scmp.ne.s32.totalorder %s627_s0, %s449_s11  ;;  %s19_s8 = int_to_ptr.vmem [resolvable:$true] %s18_s8 }
  0x15   :  { %p453_p9 = scmp.lt.u32.totalorder %s449_s11, %s627_s0 }
  0x17   :  { %p455_p10 = pnand %p453_p9, %p450_p8 }
  0x19   :  { %458 = shalt.err (!%p455_p10)
}
  0x1a   :  { %s459_s16 = scalar_lea.vmem %s19_s8, 256  ;;  %p464_p12 = scmp.lt.s32.totalorder %s19_s8, %s19_s8 }
  0x1b   :  { %p460_p11 = scmp.ne.s32.totalorder %s19_s8, %s459_s16  ;;  %p465_p13 = scmp.lt.s32.totalorder %s459_s16, %s459_s16 }
  0x1d   :  { %p466_p0 = por %p465_p13, %p464_p12 }
  0x1f   :  { %p467_p1 = pnand %p466_p0, %p460_p11 }
  0x21   :  { %470 = shalt.err (!%p467_p1)
}
  0x22   :  { %s525_s1 = smov 128   ;;  %s526_s17 = smov 8  }
  0x23   :  { %24 = dma.hbm_to_vmem [thread:$0]  %s627_s0, 256, %s19_s8, [#allocation3], %s525_s1, %s525_s1, %s526_s17  }
  0x24   :  { %s527_s20 = smov [#allocation7]   ;;  %s471_s24 = scalar_lea.hbm %s630_s3, 1024 }
  0x25   :  { %s44_s21 = sshll.u32 %s527_s20, 4  ;;  %p472_p2 = scmp.ne.s32.totalorder %s630_s3, %s471_s24  ;;  %s45_s21 = int_to_ptr.vmem [resolvable:$true] %s44_s21 }
  0x26   :  { %p475_p3 = scmp.lt.u32.totalorder %s471_s24, %s630_s3 }
  0x28   :  { %p477_p4 = pnand %p475_p3, %p472_p2 }
  0x2a   :  { %480 = shalt.err (!%p477_p4)
}
  0x2b   :  { %s481_s6 = scalar_lea.vmem %s45_s21, 1024  ;;  %p486_p6 = scmp.lt.s32.totalorder %s45_s21, %s45_s21 }
  0x2c   :  { %p482_p5 = scmp.ne.s32.totalorder %s45_s21, %s481_s6  ;;  %p487_p7 = scmp.lt.s32.totalorder %s481_s6, %s481_s6 }
  0x2e   :  { %p488_p8 = por %p487_p7, %p486_p6 }
  0x30   :  { %p489_p9 = pnand %p488_p8, %p482_p5 }
  0x32   :  { %492 = shalt.err (!%p489_p9)
}
  0x33   :  { %50 = dma.hbm_to_vmem [thread:$0]  %s630_s3, 1024, %s45_s21, [#allocation6], %s522_s28, %s522_s28, %s523_s29  }
  0x34   :  { %515 = dma.done.wait [#allocation3], 256  }
  0x35   :  { %516 = vsyncadd [#allocation3], 4294967040 }
  0x36   :  { %517 = dma.done.wait [#allocation6], 2048  }
  0x37   :  { %518 = vsyncadd [#allocation6], 4294965248  ;;  %v528_v0 = vmov 0.0   ;;  %vm529_vm0 = vmmov 0   ;;  %v411_v1 = vld [vmem:[#allocation5] sm:$0xff]   ;;  %v412_v2 = vld [vmem:[#allocation5 + $0x8] sm:$0xff]  }
  0x38   :  { %361 = vmatprep.subr.bf16.mxu0 %v528_v0  ;;  %377 = vmatprep.mubr.msk.bf16.mxu0 %vm529_vm0, %v528_v0  ;;  %v413_v3 = vld [vmem:[#allocation5 + $0x10] sm:$0xff]   ;;  %v419_v4 = vld [vmem:[#allocation7] sm:$0xff]   ;;  %v414_v5 = vld [vmem:[#allocation5 + $0x18] sm:$0xff]  }
  0x39   :  { %381 = vmatprep.subr.bf16.mxu1 %v528_v0  ;;  %397 = vmatprep.mubr.msk.bf16.mxu1 %vm529_vm0, %v528_v0  ;;  %v420_v6 = vld [vmem:[#allocation7 + $0x8] sm:$0xff]   ;;  %v415_v7 = vld [vmem:[#allocation5 + $0x20] sm:$0xff]   ;;  %v421_v8 = vld [vmem:[#allocation7 + $0x10] sm:$0xff]  }
  0x3a   :  { %362 = vmatpush3.bf16.msra.mxu0 %v411_v1  ;;  %382 = vmatpush3.bf16.msra.mxu1 %v419_v4  ;;  %v416_v9 = vld [vmem:[#allocation5 + $0x28] sm:$0xff]   ;;  %v422_v10 = vld [vmem:[#allocation7 + $0x18] sm:$0xff]   ;;  %v417_v11 = vld [vmem:[#allocation5 + $0x30] sm:$0xff]  }
  0x3b   :  { %363 = vmatprep.subr.bf16.mxu0 %v528_v0  ;;  %383 = vmatprep.subr.bf16.mxu1 %v528_v0  ;;  %v423_v12 = vld [vmem:[#allocation7 + $0x20] sm:$0xff]   ;;  %v418_v13 = vld [vmem:[#allocation5 + $0x38] sm:$0xff]   ;;  %v63_v14 = vld [vmem:[#allocation2] sm:$0xff] }
  0x3c   :  { %v64_v15 = vld [vmem:[#allocation2 + $0x8] sm:$0xff]  ;;  %v424_v16 = vld [vmem:[#allocation7 + $0x28] sm:$0xff]   ;;  %v425_v18 = vld [vmem:[#allocation7 + $0x30] sm:$0xff]  }
  0x3d   :  { %v65_v17 = vpack.c.bf16 %v64_v15, %v63_v14  ;;  %v426_v19 = vld [vmem:[#allocation7 + $0x38] sm:$0xff]   ;;  %v325_v20 = vld [vmem:[%s629_s2] ss:$0 sm:$0xff]  ;;  %s530_s2 = smov [#allocation8]  }
  0x3e   :  { %364 = vmatpush3.bf16.msra.mxu0 %v412_v2  ;;  %384 = vmatpush3.bf16.msra.mxu1 %v420_v6  ;;  %v334_v32 = vld [vmem:[%s631_s4] ss:$0 sm:$0xff]  ;;  %s312_s9 = sshll.u32 %s530_s2, 4  ;;  %s313_s9 = int_to_ptr.vmem [resolvable:$true] %s312_s9 }
  0x3f   :  { %365 = vmatprep.subr.bf16.mxu0 %v528_v0  ;;  %385 = vmatprep.subr.bf16.mxu1 %v528_v0  ;;  %s493_s4 = scalar_lea.vmem %s313_s9, 256  ;;  %p498_p11 = scmp.lt.s32.totalorder %s313_s9, %s313_s9 }
  0x40   :  { %p494_p10 = scmp.ne.s32.totalorder %s313_s9, %s493_s4  ;;  %p499_p12 = scmp.lt.s32.totalorder %s493_s4, %s493_s4 }
  0x42   :  { %366 = vmatpush3.bf16.msra.mxu0 %v413_v3  ;;  %386 = vmatpush3.bf16.msra.mxu1 %v421_v8  ;;  %p500_p13 = por %p499_p12, %p498_p11 }
  0x43   :  { %367 = vmatprep.subr.bf16.mxu0 %v528_v0  ;;  %387 = vmatprep.subr.bf16.mxu1 %v528_v0 }
  0x44   :  { %p501_p0 = pnand %p500_p13, %p494_p10 }
  0x46   :  { %368 = vmatpush3.bf16.msra.mxu0 %v414_v5  ;;  %388 = vmatpush3.bf16.msra.mxu1 %v422_v10 }
  0x47   :  { %369 = vmatprep.subr.bf16.mxu0 %v528_v0  ;;  %389 = vmatprep.subr.bf16.mxu1 %v528_v0 }
  0x4a   :  { %370 = vmatpush3.bf16.msra.mxu0 %v415_v7  ;;  %390 = vmatpush3.bf16.msra.mxu1 %v423_v12 }
  0x4b   :  { %371 = vmatprep.subr.bf16.mxu0 %v528_v0  ;;  %391 = vmatprep.subr.bf16.mxu1 %v528_v0 }
  0x4e   :  { %372 = vmatpush3.bf16.msra.mxu0 %v416_v9  ;;  %392 = vmatpush3.bf16.msra.mxu1 %v424_v16 }
  0x4f   :  { %373 = vmatprep.subr.bf16.mxu0 %v528_v0  ;;  %393 = vmatprep.subr.bf16.mxu1 %v528_v0 }
  0x52   :  { %374 = vmatpush3.bf16.msra.mxu0 %v417_v11  ;;  %394 = vmatpush3.bf16.msra.mxu1 %v425_v18 }
  0x53   :  { %375 = vmatprep.subr.bf16.mxu0 %v528_v0  ;;  %395 = vmatprep.subr.bf16.mxu1 %v528_v0 }
  0x56   :  { %376 = vmatpush3.bf16.msra.mxu0 %v418_v13  ;;  %396 = vmatpush3.bf16.msra.mxu1 %v426_v19 }
  0x59   :  { %378 = vmatmul.mubr.bf16.vlgmr.msra.gmra.mrb[0].mxu0 %v65_v17 }
 0x12c   :  { %v171_v21 = vpop.f32.mrb[0].mxu0 }
 0x12d   :  { %v172_v22 = vadd.f32 %v325_v20, %v171_v21  ;;  %v379_v23 = vpop.f32.mrb[1].mxu0 }
 0x12e   :  { %v174_v24 = vpop.f32.mrb[2].mxu0 }
 0x12f   :  { %v180_v25 = vmul.f32 0.1, %v172_v22  ;;  %v175_v26 = vadd.f32 %v325_v20, %v174_v24  ;;  %v380_v27 = vpop.f32.mrb[3].mxu0  ;;  %vm178_vm1 = vcmp.gt.f32.partialorder %v172_v22, 0.0 }
 0x131   :  { %vm179_vm2 = vcmp.gt.f32.partialorder %v175_v26, 0.0  ;;  %v181_v28 = vmul.f32 0.1, %v175_v26  ;;  %v182_v29 = vsel %vm178_vm1, %v172_v22, %v180_v25 }
 0x133   :  { %v183_v30 = vsel %vm179_vm2, %v175_v26, %v181_v28 }
 0x134   :  { %v184_v31 = vpack.c.bf16 %v183_v30, %v182_v29 }
 0x136   :  { %398 = vmatmul.mubr.bf16.vlgmr.msra.gmra.mrb[0].mxu1 %v184_v31 }
 0x209   :  { %v290_v33 = vpop.f32.mrb[0].mxu1 }
 0x20a   :  { %v291_v34 = vadd.f32 %v334_v32, %v290_v33  ;;  %v399_v35 = vpop.f32.mrb[1].mxu1 }
 0x20b   :  { %v293_v36 = vpop.f32.mrb[2].mxu1 }
 0x20c   :  { %v297_v37 = vadd.f32 %v291_v34, %v63_v14  ;;  %v294_v38 = vadd.f32 %v334_v32, %v293_v36  ;;  %v400_v39 = vpop.f32.mrb[3].mxu1 }
 0x20e   :  { %v301_v40 = vmul.f32 0.1, %v297_v37  ;;  %v298_v41 = vadd.f32 %v294_v38, %v64_v15  ;;  %vm299_vm3 = vcmp.gt.f32.partialorder %v297_v37, 0.0 }
 0x210   :  { %v302_v42 = vmul.f32 0.1, %v298_v41  ;;  %vm300_vm4 = vcmp.gt.f32.partialorder %v298_v41, 0.0  ;;  %v303_v43 = vsel %vm299_vm3, %v297_v37, %v301_v40 }
 0x211   :  { %305 = vst [vmem:[#allocation8] sm:$0xff] %v303_v43 }
 0x212   :  { %v304_v44 = vsel %vm300_vm4, %v298_v41, %v302_v42 }
 0x213   :  { %306 = vst [vmem:[#allocation8 + $0x8] sm:$0xff] %v304_v44 }
 0x214   :  { %504 = shalt.err (!%p501_p0)
}
 0x215   :  { %s505_s12 = scalar_lea.hbm %s632_s5, 256 }
 0x216   :  { %p506_p1 = scmp.ne.s32.totalorder %s632_s5, %s505_s12  ;;  %p509_p2 = scmp.lt.u32.totalorder %s505_s12, %s632_s5 }
 0x218   :  { %p511_p3 = pnand %p509_p2, %p506_p1 }
 0x21a   :  { %514 = shalt.err (!%p511_p3)
}
 0x21b   :  { %318 = dma.vmem_to_hbm [thread:$0]  %s313_s9, 256, %s632_s5, [#allocation4], %s525_s1, %s525_s1, %s526_s17  }
 0x21c   :  { %519 = dma.done.wait [#allocation4], 256  }
 0x21d   :  { %520 = vsyncadd [#allocation4], 4294967040 }
 0x21e   :  { %322 = vsyncpa [#allocation3], 1 }
 0x21f   :  { %323 = vsyncpa [#allocation6], 1 }
 0x220   :  { %324 = vsyncpa [#allocation4], 1 }

</bundles_post_ra>
